<compile_context>
chip_gen: v6e
topology: v6e:2x2x1
jax: 0.10.0
libtpu: 0.0.40
codegen_flags: <defaults>
</compile_context>

<pallas_src>
import math

import jax
import jax.numpy as jnp
from jax import lax
from jax.experimental import pallas as pl
from jax.experimental.pallas import tpu as pltpu

_LANES = 128

# Packed-parameter layout (flat f32[80] kept in SMEM):
_W1_OFF, _B1_OFF = 0, 16      # w1: [8, 2] row-major, b1: [8]
_W2_OFF, _B2_OFF = 24, 56     # w2: [4, 8] row-major, b2: [4]
_W3_OFF, _B3_OFF = 60, 76     # w3: [4, 4] row-major, b3: [4]
_N_PARAMS = 80


def _round_up(a, b):
    return -(-a // b) * b


def _make_kernel(sub, n_chunks, unroll, compute_dtype):
    """Builds the fused-MLP kernel for a (2, tb, 128) -> (4, tb, 128) block."""
    cast_params = jnp.dtype(compute_dtype) != jnp.dtype(jnp.float32)

    def kernel(x_ref, p_ref, o_ref):
        # Hoist all 80 scalar parameter loads once per block (loop-invariant).
        def p(i):
            s = p_ref[i]
            return s.astype(compute_dtype) if cast_params else s

        w1 = [[p(_W1_OFF + 2 * k + c) for c in range(2)] for k in range(8)]
        b1 = [p(_B1_OFF + k) for k in range(8)]
        w2 = [[p(_W2_OFF + 8 * j + k) for k in range(8)] for j in range(4)]
        b2 = [p(_B2_OFF + j) for j in range(4)]
        w3 = [[p(_W3_OFF + 4 * j + k) for k in range(4)] for j in range(4)]
        b3 = [p(_B3_OFF + j) for j in range(4)]

        def body(r, carry):
            off = r * sub
            if not isinstance(off, int):
                off = pl.multiple_of(off, sub)
            x0 = x_ref[0, pl.ds(off, sub), :].astype(compute_dtype)
            x1 = x_ref[1, pl.ds(off, sub), :].astype(compute_dtype)

            # Layers 1+2 fused: stream over the 8 hidden units of layer 1 and
            # accumulate straight into the 4 layer-2 pre-activations; only
            # ~13 single-strip arrays are live at once (register-resident).
            acc2 = [None] * 4
            for k in range(8):
                h1k = jnp.maximum(w1[k][0] * x0 + w1[k][1] * x1 + b1[k], 0.0)
                for j in range(4):
                    t = w2[j][k] * h1k
                    acc2[j] = t if acc2[j] is None else acc2[j] + t
            h2 = [jnp.maximum(acc2[j] + b2[j], 0.0) for j in range(4)]

            # Layer 3: Linear(4 -> 4), no activation; store one strip per unit.
            for j in range(4):
                acc = w3[j][0] * h2[0]
                for k in range(1, 4):
                    acc = acc + w3[j][k] * h2[k]
                o_ref[j, pl.ds(off, sub), :] = (acc + b3[j]).astype(o_ref.dtype)
            return carry

        if n_chunks == 1:
            body(0, 0)
        else:
            lax.fori_loop(0, n_chunks, body, 0, unroll=unroll)

    return kernel


def pack_params(params):
    """Pack PyTorch-convention weights ([out,in]) and biases ([out]) into f32[80]."""
    flat = jnp.concatenate([
        params["w1"].reshape(-1), params["b1"].reshape(-1),
        params["w2"].reshape(-1), params["b2"].reshape(-1),
        params["w3"].reshape(-1), params["b3"].reshape(-1),
    ]).astype(jnp.float32)
    assert flat.shape == (_N_PARAMS,)
    return flat


def feature_extractor_fm(x_fm, params, *, tile_b=2048,
                         compute_dtype=jnp.float32, out_dtype=jnp.float32):
    """Feature-major entry point (the hot path).  x_fm: [2, N] f32 -> [4, N]."""
    f_in, n = x_fm.shape
    assert f_in == 2, f_in

    # Native sublane strip: (8,128) for pure f32; (16,128) if bf16 is involved
    # (sub-32-bit dtypes pack along sublanes).
    sub = 8
    if (jnp.dtype(compute_dtype) == jnp.dtype(jnp.bfloat16)
            or jnp.dtype(out_dtype) == jnp.dtype(jnp.bfloat16)):
        sub = 16

    n_rows = _round_up(max(n, 1), _LANES) // _LANES

    # Work-balanced, padding-capped tile choice.
    tile_b = max(int(tile_b), sub)
    n_steps = max(1, -(-n_rows // tile_b))
    # v7x megacore: with dimension_semantics=("parallel",) a 1-step grid runs
    # on a single TensorCore -- use >=2 steps when there is enough work.
    if n_steps == 1 and n_rows > sub:
        n_steps = 2
    tb = max(sub, _round_up(-(-n_rows // n_steps), sub))
    n_steps = -(-n_rows // tb)
    n_rows_pad = n_steps * tb
    n_pad = n_rows_pad * _LANES

    if n_pad != n:
        # TODO(synk): in a full DANN pipeline keep activations feature-major and
        # pre-padded so this pad (an extra HBM pass) happens once, not per layer.
        x_fm = jnp.pad(x_fm, ((0, 0), (0, n_pad - n)))
    x3 = x_fm.reshape(f_in, n_rows_pad, _LANES)   # contiguous -> free reshape

    p_flat = pack_params(params)

    n_chunks = tb // sub
    unroll = min(8, n_chunks)
    kernel = _make_kernel(sub, n_chunks, unroll, compute_dtype)

    out3 = pl.pallas_call(
        kernel,
        out_shape=jax.ShapeDtypeStruct((4, n_rows_pad, _LANES), out_dtype),
        grid=(n_steps,),
        in_specs=[
            pl.BlockSpec((2, tb, _LANES), lambda i: (0, i, 0)),
            pl.BlockSpec(memory_space=pltpu.MemorySpace.SMEM),   # packed params
        ],
        out_specs=pl.BlockSpec((4, tb, _LANES), lambda i: (0, i, 0)),
        compiler_params=pltpu.CompilerParams(
            dimension_semantics=("parallel",),
        ),
    )(x3, p_flat)

    return out3.reshape(4, n_pad)[:, :n]


def feature_extractor(x, params, *, tile_b=2048,
                      compute_dtype=jnp.float32, out_dtype=jnp.float32):
    """Drop-in PyTorch-layout wrapper: x [N, 2] f32 -> [N, out_dtype 4].

    The transposes live outside the kernel; keep activations feature-major in a
    real DANN pipeline to avoid them entirely (they are extra HBM passes).
    """
    return feature_extractor_fm(
        x.T, params, tile_b=tile_b,
        compute_dtype=compute_dtype, out_dtype=out_dtype).T


def init_params(key):
    """PyTorch nn.Linear default init: U(-1/sqrt(fan_in), 1/sqrt(fan_in)).
    Weights stored PyTorch-style as [out_features, in_features]."""
    dims = [(2, 8), (8, 4), (4, 4)]
    params = {}
    keys = jax.random.split(key, 2 * len(dims))
    for idx, (fan_in, fan_out) in enumerate(dims):
        bound = 1.0 / math.sqrt(fan_in)
        wk, bk = keys[2 * idx], keys[2 * idx + 1]
        params[f"w{idx + 1}"] = jax.random.uniform(
            wk, (fan_out, fan_in), jnp.float32, minval=-bound, maxval=bound)
        params[f"b{idx + 1}"] = jax.random.uniform(
            bk, (fan_out,), jnp.float32, minval=-bound, maxval=bound)
    return params


def _reference(x, p):
    h = jnp.maximum(x @ p["w1"].T + p["b1"], 0.0)
    h = jnp.maximum(h @ p["w2"].T + p["b2"], 0.0)
    return h @ p["w3"].T + p["b3"]


if __name__ == "__main__":
    key = jax.random.PRNGKey(0)
    pkey, xkey, x2key = jax.random.split(key, 3)
    params = init_params(pkey)

    # 1) Small batch of 2-feature inputs, consistent with Linear(2, ...).
    x = jax.random.normal(xkey, (16, 2), dtype=jnp.float32)
    out = jax.block_until_ready(feature_extractor(x, params))
    ref = _reference(x, params)
    assert out.shape == (16, 4), out.shape
    assert jnp.allclose(out, ref, atol=1e-5, rtol=1e-5), "mismatch (N=16)"

    # 2) Exercise the strip-mined fori_loop (multiple sublane chunks per block)
    #    with the default tile and the >=2-step grid clamp.
    x2 = jax.random.normal(x2key, (5000, 2), dtype=jnp.float32)
    out2 = jax.block_until_ready(feature_extractor(x2, params))
    ref2 = _reference(x2, params)
    assert out2.shape == (5000, 4), out2.shape
    assert jnp.allclose(out2, ref2, atol=1e-5, rtol=1e-5), "mismatch (N=5000)"

    # 3) Exercise a multi-step grid with a tiny tile (padding + grid logic).
    out3 = jax.block_until_ready(feature_extractor(x2, params, tile_b=8))
    assert out3.shape == (5000, 4), out3.shape
    assert jnp.allclose(out3, ref2, atol=1e-5, rtol=1e-5), "mismatch (tile_b=8)"

    # 4) v5e HBM-writeback lever: bf16 OUTPUT with f32 compute (16-sublane strips).
    out_bf = jax.block_until_ready(
        feature_extractor(x, params, out_dtype=jnp.bfloat16))
    assert out_bf.shape == (16, 4) and out_bf.dtype == jnp.bfloat16
    assert jnp.allclose(out_bf.astype(jnp.float32), ref, atol=2e-2, rtol=2e-2), \
        "mismatch (bf16 out)"

    # NOTE: compute_dtype=jnp.bfloat16 (v6e/v7x VALU lever) is available but
    # numerics-changing; validate its lowering on target hardware before use.

    print("KERNEL_OK")
</pallas_src>

<mosaic_0001>
module attributes {stable_mosaic.version = 11 : i64} {
  func.func @kernel(%arg0: i32, %arg1: memref<2x8x128xf32, #tpu.memory_space<vmem>>, %arg2: memref<80xf32, #tpu.memory_space<smem>>, %arg3: memref<4x8x128xf32, #tpu.memory_space<vmem>>) attributes {dimension_semantics = [#tpu.dimension_semantics<parallel>], iteration_bounds = array<i64: 1>, scalar_prefetch = 0 : i64, scratch_operands = 0 : i64, tpu.core_type = #tpu.core_type<tc>, window_params = [{transform_indices = @transform_0, window_bounds = array<i64: 2, 8, 128>}, {transform_indices = @transform_1, window_bounds = array<i64: 80>}, {transform_indices = @transform_2, window_bounds = array<i64: 4, 8, 128>}]} {
    %c0 = arith.constant 0 : index
    %0 = memref.load %arg2[%c0] : memref<80xf32, #tpu.memory_space<smem>>
    %c1 = arith.constant 1 : index
    %1 = memref.load %arg2[%c1] : memref<80xf32, #tpu.memory_space<smem>>
    %c2 = arith.constant 2 : index
    %2 = memref.load %arg2[%c2] : memref<80xf32, #tpu.memory_space<smem>>
    %c3 = arith.constant 3 : index
    %3 = memref.load %arg2[%c3] : memref<80xf32, #tpu.memory_space<smem>>
    %c4 = arith.constant 4 : index
    %4 = memref.load %arg2[%c4] : memref<80xf32, #tpu.memory_space<smem>>
    %c5 = arith.constant 5 : index
    %5 = memref.load %arg2[%c5] : memref<80xf32, #tpu.memory_space<smem>>
    %c6 = arith.constant 6 : index
    %6 = memref.load %arg2[%c6] : memref<80xf32, #tpu.memory_space<smem>>
    %c7 = arith.constant 7 : index
    %7 = memref.load %arg2[%c7] : memref<80xf32, #tpu.memory_space<smem>>
    %c8 = arith.constant 8 : index
    %8 = memref.load %arg2[%c8] : memref<80xf32, #tpu.memory_space<smem>>
    %c9 = arith.constant 9 : index
    %9 = memref.load %arg2[%c9] : memref<80xf32, #tpu.memory_space<smem>>
    %c10 = arith.constant 10 : index
    %10 = memref.load %arg2[%c10] : memref<80xf32, #tpu.memory_space<smem>>
    %c11 = arith.constant 11 : index
    %11 = memref.load %arg2[%c11] : memref<80xf32, #tpu.memory_space<smem>>
    %c12 = arith.constant 12 : index
    %12 = memref.load %arg2[%c12] : memref<80xf32, #tpu.memory_space<smem>>
    %c13 = arith.constant 13 : index
    %13 = memref.load %arg2[%c13] : memref<80xf32, #tpu.memory_space<smem>>
    %c14 = arith.constant 14 : index
    %14 = memref.load %arg2[%c14] : memref<80xf32, #tpu.memory_space<smem>>
    %c15 = arith.constant 15 : index
    %15 = memref.load %arg2[%c15] : memref<80xf32, #tpu.memory_space<smem>>
    %c16 = arith.constant 16 : index
    %16 = memref.load %arg2[%c16] : memref<80xf32, #tpu.memory_space<smem>>
    %c17 = arith.constant 17 : index
    %17 = memref.load %arg2[%c17] : memref<80xf32, #tpu.memory_space<smem>>
    %c18 = arith.constant 18 : index
    %18 = memref.load %arg2[%c18] : memref<80xf32, #tpu.memory_space<smem>>
    %c19 = arith.constant 19 : index
    %19 = memref.load %arg2[%c19] : memref<80xf32, #tpu.memory_space<smem>>
    %c20 = arith.constant 20 : index
    %20 = memref.load %arg2[%c20] : memref<80xf32, #tpu.memory_space<smem>>
    %c21 = arith.constant 21 : index
    %21 = memref.load %arg2[%c21] : memref<80xf32, #tpu.memory_space<smem>>
    %c22 = arith.constant 22 : index
    %22 = memref.load %arg2[%c22] : memref<80xf32, #tpu.memory_space<smem>>
    %c23 = arith.constant 23 : index
    %23 = memref.load %arg2[%c23] : memref<80xf32, #tpu.memory_space<smem>>
    %c24 = arith.constant 24 : index
    %24 = memref.load %arg2[%c24] : memref<80xf32, #tpu.memory_space<smem>>
    %c25 = arith.constant 25 : index
    %25 = memref.load %arg2[%c25] : memref<80xf32, #tpu.memory_space<smem>>
    %c26 = arith.constant 26 : index
    %26 = memref.load %arg2[%c26] : memref<80xf32, #tpu.memory_space<smem>>
    %c27 = arith.constant 27 : index
    %27 = memref.load %arg2[%c27] : memref<80xf32, #tpu.memory_space<smem>>
    %c28 = arith.constant 28 : index
    %28 = memref.load %arg2[%c28] : memref<80xf32, #tpu.memory_space<smem>>
    %c29 = arith.constant 29 : index
    %29 = memref.load %arg2[%c29] : memref<80xf32, #tpu.memory_space<smem>>
    %c30 = arith.constant 30 : index
    %30 = memref.load %arg2[%c30] : memref<80xf32, #tpu.memory_space<smem>>
    %c31 = arith.constant 31 : index
    %31 = memref.load %arg2[%c31] : memref<80xf32, #tpu.memory_space<smem>>
    %c32 = arith.constant 32 : index
    %32 = memref.load %arg2[%c32] : memref<80xf32, #tpu.memory_space<smem>>
    %c33 = arith.constant 33 : index
    %33 = memref.load %arg2[%c33] : memref<80xf32, #tpu.memory_space<smem>>
    %c34 = arith.constant 34 : index
    %34 = memref.load %arg2[%c34] : memref<80xf32, #tpu.memory_space<smem>>
    %c35 = arith.constant 35 : index
    %35 = memref.load %arg2[%c35] : memref<80xf32, #tpu.memory_space<smem>>
    %c36 = arith.constant 36 : index
    %36 = memref.load %arg2[%c36] : memref<80xf32, #tpu.memory_space<smem>>
    %c37 = arith.constant 37 : index
    %37 = memref.load %arg2[%c37] : memref<80xf32, #tpu.memory_space<smem>>
    %c38 = arith.constant 38 : index
    %38 = memref.load %arg2[%c38] : memref<80xf32, #tpu.memory_space<smem>>
    %c39 = arith.constant 39 : index
    %39 = memref.load %arg2[%c39] : memref<80xf32, #tpu.memory_space<smem>>
    %c40 = arith.constant 40 : index
    %40 = memref.load %arg2[%c40] : memref<80xf32, #tpu.memory_space<smem>>
    %c41 = arith.constant 41 : index
    %41 = memref.load %arg2[%c41] : memref<80xf32, #tpu.memory_space<smem>>
    %c42 = arith.constant 42 : index
    %42 = memref.load %arg2[%c42] : memref<80xf32, #tpu.memory_space<smem>>
    %c43 = arith.constant 43 : index
    %43 = memref.load %arg2[%c43] : memref<80xf32, #tpu.memory_space<smem>>
    %c44 = arith.constant 44 : index
    %44 = memref.load %arg2[%c44] : memref<80xf32, #tpu.memory_space<smem>>
    %c45 = arith.constant 45 : index
    %45 = memref.load %arg2[%c45] : memref<80xf32, #tpu.memory_space<smem>>
    %c46 = arith.constant 46 : index
    %46 = memref.load %arg2[%c46] : memref<80xf32, #tpu.memory_space<smem>>
    %c47 = arith.constant 47 : index
    %47 = memref.load %arg2[%c47] : memref<80xf32, #tpu.memory_space<smem>>
    %c48 = arith.constant 48 : index
    %48 = memref.load %arg2[%c48] : memref<80xf32, #tpu.memory_space<smem>>
    %c49 = arith.constant 49 : index
    %49 = memref.load %arg2[%c49] : memref<80xf32, #tpu.memory_space<smem>>
    %c50 = arith.constant 50 : index
    %50 = memref.load %arg2[%c50] : memref<80xf32, #tpu.memory_space<smem>>
    %c51 = arith.constant 51 : index
    %51 = memref.load %arg2[%c51] : memref<80xf32, #tpu.memory_space<smem>>
    %c52 = arith.constant 52 : index
    %52 = memref.load %arg2[%c52] : memref<80xf32, #tpu.memory_space<smem>>
    %c53 = arith.constant 53 : index
    %53 = memref.load %arg2[%c53] : memref<80xf32, #tpu.memory_space<smem>>
    %c54 = arith.constant 54 : index
    %54 = memref.load %arg2[%c54] : memref<80xf32, #tpu.memory_space<smem>>
    %c55 = arith.constant 55 : index
    %55 = memref.load %arg2[%c55] : memref<80xf32, #tpu.memory_space<smem>>
    %c56 = arith.constant 56 : index
    %56 = memref.load %arg2[%c56] : memref<80xf32, #tpu.memory_space<smem>>
    %c57 = arith.constant 57 : index
    %57 = memref.load %arg2[%c57] : memref<80xf32, #tpu.memory_space<smem>>
    %c58 = arith.constant 58 : index
    %58 = memref.load %arg2[%c58] : memref<80xf32, #tpu.memory_space<smem>>
    %c59 = arith.constant 59 : index
    %59 = memref.load %arg2[%c59] : memref<80xf32, #tpu.memory_space<smem>>
    %c60 = arith.constant 60 : index
    %60 = memref.load %arg2[%c60] : memref<80xf32, #tpu.memory_space<smem>>
    %c61 = arith.constant 61 : index
    %61 = memref.load %arg2[%c61] : memref<80xf32, #tpu.memory_space<smem>>
    %c62 = arith.constant 62 : index
    %62 = memref.load %arg2[%c62] : memref<80xf32, #tpu.memory_space<smem>>
    %c63 = arith.constant 63 : index
    %63 = memref.load %arg2[%c63] : memref<80xf32, #tpu.memory_space<smem>>
    %c64 = arith.constant 64 : index
    %64 = memref.load %arg2[%c64] : memref<80xf32, #tpu.memory_space<smem>>
    %c65 = arith.constant 65 : index
    %65 = memref.load %arg2[%c65] : memref<80xf32, #tpu.memory_space<smem>>
    %c66 = arith.constant 66 : index
    %66 = memref.load %arg2[%c66] : memref<80xf32, #tpu.memory_space<smem>>
    %c67 = arith.constant 67 : index
    %67 = memref.load %arg2[%c67] : memref<80xf32, #tpu.memory_space<smem>>
    %c68 = arith.constant 68 : index
    %68 = memref.load %arg2[%c68] : memref<80xf32, #tpu.memory_space<smem>>
    %c69 = arith.constant 69 : index
    %69 = memref.load %arg2[%c69] : memref<80xf32, #tpu.memory_space<smem>>
    %c70 = arith.constant 70 : index
    %70 = memref.load %arg2[%c70] : memref<80xf32, #tpu.memory_space<smem>>
    %c71 = arith.constant 71 : index
    %71 = memref.load %arg2[%c71] : memref<80xf32, #tpu.memory_space<smem>>
    %c72 = arith.constant 72 : index
    %72 = memref.load %arg2[%c72] : memref<80xf32, #tpu.memory_space<smem>>
    %c73 = arith.constant 73 : index
    %73 = memref.load %arg2[%c73] : memref<80xf32, #tpu.memory_space<smem>>
    %c74 = arith.constant 74 : index
    %74 = memref.load %arg2[%c74] : memref<80xf32, #tpu.memory_space<smem>>
    %c75 = arith.constant 75 : index
    %75 = memref.load %arg2[%c75] : memref<80xf32, #tpu.memory_space<smem>>
    %c76 = arith.constant 76 : index
    %76 = memref.load %arg2[%c76] : memref<80xf32, #tpu.memory_space<smem>>
    %c77 = arith.constant 77 : index
    %77 = memref.load %arg2[%c77] : memref<80xf32, #tpu.memory_space<smem>>
    %c78 = arith.constant 78 : index
    %78 = memref.load %arg2[%c78] : memref<80xf32, #tpu.memory_space<smem>>
    %c79 = arith.constant 79 : index
    %79 = memref.load %arg2[%c79] : memref<80xf32, #tpu.memory_space<smem>>
    %c0_0 = arith.constant 0 : index
    %c0_1 = arith.constant 0 : index
    %c0_2 = arith.constant 0 : index
    %80 = vector.load %arg1[%c0_0, %c0_1, %c0_2] : memref<2x8x128xf32, #tpu.memory_space<vmem>>, vector<1x8x128xf32>
    %81 = vector.shape_cast %80 : vector<1x8x128xf32> to vector<8x128xf32>
    %c1_3 = arith.constant 1 : index
    %c0_4 = arith.constant 0 : index
    %c0_5 = arith.constant 0 : index
    %82 = vector.load %arg1[%c1_3, %c0_4, %c0_5] : memref<2x8x128xf32, #tpu.memory_space<vmem>>, vector<1x8x128xf32>
    %83 = vector.shape_cast %82 : vector<1x8x128xf32> to vector<8x128xf32>
    %84 = vector.broadcast %0 : f32 to vector<8x128xf32>
    %85 = arith.mulf %84, %81 : vector<8x128xf32>
    %86 = vector.broadcast %1 : f32 to vector<8x128xf32>
    %87 = arith.mulf %86, %83 : vector<8x128xf32>
    %88 = arith.addf %85, %87 : vector<8x128xf32>
    %89 = vector.broadcast %16 : f32 to vector<8x128xf32>
    %90 = arith.addf %88, %89 : vector<8x128xf32>
    %cst = arith.constant 0.000000e+00 : f32
    %91 = vector.broadcast %cst : f32 to vector<8x128xf32>
    %92 = arith.maximumf %90, %91 : vector<8x128xf32>
    %93 = vector.broadcast %24 : f32 to vector<8x128xf32>
    %94 = arith.mulf %93, %92 : vector<8x128xf32>
    %95 = vector.broadcast %32 : f32 to vector<8x128xf32>
    %96 = arith.mulf %95, %92 : vector<8x128xf32>
    %97 = vector.broadcast %40 : f32 to vector<8x128xf32>
    %98 = arith.mulf %97, %92 : vector<8x128xf32>
    %99 = vector.broadcast %48 : f32 to vector<8x128xf32>
    %100 = arith.mulf %99, %92 : vector<8x128xf32>
    %101 = vector.broadcast %2 : f32 to vector<8x128xf32>
    %102 = arith.mulf %101, %81 : vector<8x128xf32>
    %103 = vector.broadcast %3 : f32 to vector<8x128xf32>
    %104 = arith.mulf %103, %83 : vector<8x128xf32>
    %105 = arith.addf %102, %104 : vector<8x128xf32>
    %106 = vector.broadcast %17 : f32 to vector<8x128xf32>
    %107 = arith.addf %105, %106 : vector<8x128xf32>
    %cst_6 = arith.constant 0.000000e+00 : f32
    %108 = vector.broadcast %cst_6 : f32 to vector<8x128xf32>
    %109 = arith.maximumf %107, %108 : vector<8x128xf32>
    %110 = vector.broadcast %25 : f32 to vector<8x128xf32>
    %111 = arith.mulf %110, %109 : vector<8x128xf32>
    %112 = arith.addf %94, %111 : vector<8x128xf32>
    %113 = vector.broadcast %33 : f32 to vector<8x128xf32>
    %114 = arith.mulf %113, %109 : vector<8x128xf32>
    %115 = arith.addf %96, %114 : vector<8x128xf32>
    %116 = vector.broadcast %41 : f32 to vector<8x128xf32>
    %117 = arith.mulf %116, %109 : vector<8x128xf32>
    %118 = arith.addf %98, %117 : vector<8x128xf32>
    %119 = vector.broadcast %49 : f32 to vector<8x128xf32>
    %120 = arith.mulf %119, %109 : vector<8x128xf32>
    %121 = arith.addf %100, %120 : vector<8x128xf32>
    %122 = vector.broadcast %4 : f32 to vector<8x128xf32>
    %123 = arith.mulf %122, %81 : vector<8x128xf32>
    %124 = vector.broadcast %5 : f32 to vector<8x128xf32>
    %125 = arith.mulf %124, %83 : vector<8x128xf32>
    %126 = arith.addf %123, %125 : vector<8x128xf32>
    %127 = vector.broadcast %18 : f32 to vector<8x128xf32>
    %128 = arith.addf %126, %127 : vector<8x128xf32>
    %cst_7 = arith.constant 0.000000e+00 : f32
    %129 = vector.broadcast %cst_7 : f32 to vector<8x128xf32>
    %130 = arith.maximumf %128, %129 : vector<8x128xf32>
    %131 = vector.broadcast %26 : f32 to vector<8x128xf32>
    %132 = arith.mulf %131, %130 : vector<8x128xf32>
    %133 = arith.addf %112, %132 : vector<8x128xf32>
    %134 = vector.broadcast %34 : f32 to vector<8x128xf32>
    %135 = arith.mulf %134, %130 : vector<8x128xf32>
    %136 = arith.addf %115, %135 : vector<8x128xf32>
    %137 = vector.broadcast %42 : f32 to vector<8x128xf32>
    %138 = arith.mulf %137, %130 : vector<8x128xf32>
    %139 = arith.addf %118, %138 : vector<8x128xf32>
    %140 = vector.broadcast %50 : f32 to vector<8x128xf32>
    %141 = arith.mulf %140, %130 : vector<8x128xf32>
    %142 = arith.addf %121, %141 : vector<8x128xf32>
    %143 = vector.broadcast %6 : f32 to vector<8x128xf32>
    %144 = arith.mulf %143, %81 : vector<8x128xf32>
    %145 = vector.broadcast %7 : f32 to vector<8x128xf32>
    %146 = arith.mulf %145, %83 : vector<8x128xf32>
    %147 = arith.addf %144, %146 : vector<8x128xf32>
    %148 = vector.broadcast %19 : f32 to vector<8x128xf32>
    %149 = arith.addf %147, %148 : vector<8x128xf32>
    %cst_8 = arith.constant 0.000000e+00 : f32
    %150 = vector.broadcast %cst_8 : f32 to vector<8x128xf32>
    %151 = arith.maximumf %149, %150 : vector<8x128xf32>
    %152 = vector.broadcast %27 : f32 to vector<8x128xf32>
    %153 = arith.mulf %152, %151 : vector<8x128xf32>
    %154 = arith.addf %133, %153 : vector<8x128xf32>
    %155 = vector.broadcast %35 : f32 to vector<8x128xf32>
    %156 = arith.mulf %155, %151 : vector<8x128xf32>
    %157 = arith.addf %136, %156 : vector<8x128xf32>
    %158 = vector.broadcast %43 : f32 to vector<8x128xf32>
    %159 = arith.mulf %158, %151 : vector<8x128xf32>
    %160 = arith.addf %139, %159 : vector<8x128xf32>
    %161 = vector.broadcast %51 : f32 to vector<8x128xf32>
    %162 = arith.mulf %161, %151 : vector<8x128xf32>
    %163 = arith.addf %142, %162 : vector<8x128xf32>
    %164 = vector.broadcast %8 : f32 to vector<8x128xf32>
    %165 = arith.mulf %164, %81 : vector<8x128xf32>
    %166 = vector.broadcast %9 : f32 to vector<8x128xf32>
    %167 = arith.mulf %166, %83 : vector<8x128xf32>
    %168 = arith.addf %165, %167 : vector<8x128xf32>
    %169 = vector.broadcast %20 : f32 to vector<8x128xf32>
    %170 = arith.addf %168, %169 : vector<8x128xf32>
    %cst_9 = arith.constant 0.000000e+00 : f32
    %171 = vector.broadcast %cst_9 : f32 to vector<8x128xf32>
    %172 = arith.maximumf %170, %171 : vector<8x128xf32>
    %173 = vector.broadcast %28 : f32 to vector<8x128xf32>
    %174 = arith.mulf %173, %172 : vector<8x128xf32>
    %175 = arith.addf %154, %174 : vector<8x128xf32>
    %176 = vector.broadcast %36 : f32 to vector<8x128xf32>
    %177 = arith.mulf %176, %172 : vector<8x128xf32>
    %178 = arith.addf %157, %177 : vector<8x128xf32>
    %179 = vector.broadcast %44 : f32 to vector<8x128xf32>
    %180 = arith.mulf %179, %172 : vector<8x128xf32>
    %181 = arith.addf %160, %180 : vector<8x128xf32>
    %182 = vector.broadcast %52 : f32 to vector<8x128xf32>
    %183 = arith.mulf %182, %172 : vector<8x128xf32>
    %184 = arith.addf %163, %183 : vector<8x128xf32>
    %185 = vector.broadcast %10 : f32 to vector<8x128xf32>
    %186 = arith.mulf %185, %81 : vector<8x128xf32>
    %187 = vector.broadcast %11 : f32 to vector<8x128xf32>
    %188 = arith.mulf %187, %83 : vector<8x128xf32>
    %189 = arith.addf %186, %188 : vector<8x128xf32>
    %190 = vector.broadcast %21 : f32 to vector<8x128xf32>
    %191 = arith.addf %189, %190 : vector<8x128xf32>
    %cst_10 = arith.constant 0.000000e+00 : f32
    %192 = vector.broadcast %cst_10 : f32 to vector<8x128xf32>
    %193 = arith.maximumf %191, %192 : vector<8x128xf32>
    %194 = vector.broadcast %29 : f32 to vector<8x128xf32>
    %195 = arith.mulf %194, %193 : vector<8x128xf32>
    %196 = arith.addf %175, %195 : vector<8x128xf32>
    %197 = vector.broadcast %37 : f32 to vector<8x128xf32>
    %198 = arith.mulf %197, %193 : vector<8x128xf32>
    %199 = arith.addf %178, %198 : vector<8x128xf32>
    %200 = vector.broadcast %45 : f32 to vector<8x128xf32>
    %201 = arith.mulf %200, %193 : vector<8x128xf32>
    %202 = arith.addf %181, %201 : vector<8x128xf32>
    %203 = vector.broadcast %53 : f32 to vector<8x128xf32>
    %204 = arith.mulf %203, %193 : vector<8x128xf32>
    %205 = arith.addf %184, %204 : vector<8x128xf32>
    %206 = vector.broadcast %12 : f32 to vector<8x128xf32>
    %207 = arith.mulf %206, %81 : vector<8x128xf32>
    %208 = vector.broadcast %13 : f32 to vector<8x128xf32>
    %209 = arith.mulf %208, %83 : vector<8x128xf32>
    %210 = arith.addf %207, %209 : vector<8x128xf32>
    %211 = vector.broadcast %22 : f32 to vector<8x128xf32>
    %212 = arith.addf %210, %211 : vector<8x128xf32>
    %cst_11 = arith.constant 0.000000e+00 : f32
    %213 = vector.broadcast %cst_11 : f32 to vector<8x128xf32>
    %214 = arith.maximumf %212, %213 : vector<8x128xf32>
    %215 = vector.broadcast %30 : f32 to vector<8x128xf32>
    %216 = arith.mulf %215, %214 : vector<8x128xf32>
    %217 = arith.addf %196, %216 : vector<8x128xf32>
    %218 = vector.broadcast %38 : f32 to vector<8x128xf32>
    %219 = arith.mulf %218, %214 : vector<8x128xf32>
    %220 = arith.addf %199, %219 : vector<8x128xf32>
    %221 = vector.broadcast %46 : f32 to vector<8x128xf32>
    %222 = arith.mulf %221, %214 : vector<8x128xf32>
    %223 = arith.addf %202, %222 : vector<8x128xf32>
    %224 = vector.broadcast %54 : f32 to vector<8x128xf32>
    %225 = arith.mulf %224, %214 : vector<8x128xf32>
    %226 = arith.addf %205, %225 : vector<8x128xf32>
    %227 = vector.broadcast %14 : f32 to vector<8x128xf32>
    %228 = arith.mulf %227, %81 : vector<8x128xf32>
    %229 = vector.broadcast %15 : f32 to vector<8x128xf32>
    %230 = arith.mulf %229, %83 : vector<8x128xf32>
    %231 = arith.addf %228, %230 : vector<8x128xf32>
    %232 = vector.broadcast %23 : f32 to vector<8x128xf32>
    %233 = arith.addf %231, %232 : vector<8x128xf32>
    %cst_12 = arith.constant 0.000000e+00 : f32
    %234 = vector.broadcast %cst_12 : f32 to vector<8x128xf32>
    %235 = arith.maximumf %233, %234 : vector<8x128xf32>
    %236 = vector.broadcast %31 : f32 to vector<8x128xf32>
    %237 = arith.mulf %236, %235 : vector<8x128xf32>
    %238 = arith.addf %217, %237 : vector<8x128xf32>
    %239 = vector.broadcast %39 : f32 to vector<8x128xf32>
    %240 = arith.mulf %239, %235 : vector<8x128xf32>
    %241 = arith.addf %220, %240 : vector<8x128xf32>
    %242 = vector.broadcast %47 : f32 to vector<8x128xf32>
    %243 = arith.mulf %242, %235 : vector<8x128xf32>
    %244 = arith.addf %223, %243 : vector<8x128xf32>
    %245 = vector.broadcast %55 : f32 to vector<8x128xf32>
    %246 = arith.mulf %245, %235 : vector<8x128xf32>
    %247 = arith.addf %226, %246 : vector<8x128xf32>
    %248 = vector.broadcast %56 : f32 to vector<8x128xf32>
    %249 = arith.addf %238, %248 : vector<8x128xf32>
    %cst_13 = arith.constant 0.000000e+00 : f32
    %250 = vector.broadcast %cst_13 : f32 to vector<8x128xf32>
    %251 = arith.maximumf %249, %250 : vector<8x128xf32>
    %252 = vector.broadcast %57 : f32 to vector<8x128xf32>
    %253 = arith.addf %241, %252 : vector<8x128xf32>
    %cst_14 = arith.constant 0.000000e+00 : f32
    %254 = vector.broadcast %cst_14 : f32 to vector<8x128xf32>
    %255 = arith.maximumf %253, %254 : vector<8x128xf32>
    %256 = vector.broadcast %58 : f32 to vector<8x128xf32>
    %257 = arith.addf %244, %256 : vector<8x128xf32>
    %cst_15 = arith.constant 0.000000e+00 : f32
    %258 = vector.broadcast %cst_15 : f32 to vector<8x128xf32>
    %259 = arith.maximumf %257, %258 : vector<8x128xf32>
    %260 = vector.broadcast %59 : f32 to vector<8x128xf32>
    %261 = arith.addf %247, %260 : vector<8x128xf32>
    %cst_16 = arith.constant 0.000000e+00 : f32
    %262 = vector.broadcast %cst_16 : f32 to vector<8x128xf32>
    %263 = arith.maximumf %261, %262 : vector<8x128xf32>
    %264 = vector.broadcast %60 : f32 to vector<8x128xf32>
    %265 = arith.mulf %264, %251 : vector<8x128xf32>
    %266 = vector.broadcast %61 : f32 to vector<8x128xf32>
    %267 = arith.mulf %266, %255 : vector<8x128xf32>
    %268 = arith.addf %265, %267 : vector<8x128xf32>
    %269 = vector.broadcast %62 : f32 to vector<8x128xf32>
    %270 = arith.mulf %269, %259 : vector<8x128xf32>
    %271 = arith.addf %268, %270 : vector<8x128xf32>
    %272 = vector.broadcast %63 : f32 to vector<8x128xf32>
    %273 = arith.mulf %272, %263 : vector<8x128xf32>
    %274 = arith.addf %271, %273 : vector<8x128xf32>
    %275 = vector.broadcast %76 : f32 to vector<8x128xf32>
    %276 = arith.addf %274, %275 : vector<8x128xf32>
    %c0_17 = arith.constant 0 : index
    %c0_18 = arith.constant 0 : index
    %c0_19 = arith.constant 0 : index
    %277 = vector.load %arg3[%c0_17, %c0_18, %c0_19] : memref<4x8x128xf32, #tpu.memory_space<vmem>>, vector<1x8x128xf32>
    %278 = vector.shape_cast %277 : vector<1x8x128xf32> to vector<8x128xf32>
    %279 = vector.shape_cast %276 : vector<8x128xf32> to vector<1x8x128xf32>
    tpu.vector_store %arg3[%c0_17, %c0_18, %c0_19], %279 {strides = array<i32>} : memref<4x8x128xf32, #tpu.memory_space<vmem>>, vector<1x8x128xf32>,
    %280 = vector.broadcast %64 : f32 to vector<8x128xf32>
    %281 = arith.mulf %280, %251 : vector<8x128xf32>
    %282 = vector.broadcast %65 : f32 to vector<8x128xf32>
    %283 = arith.mulf %282, %255 : vector<8x128xf32>
    %284 = arith.addf %281, %283 : vector<8x128xf32>
    %285 = vector.broadcast %66 : f32 to vector<8x128xf32>
    %286 = arith.mulf %285, %259 : vector<8x128xf32>
    %287 = arith.addf %284, %286 : vector<8x128xf32>
    %288 = vector.broadcast %67 : f32 to vector<8x128xf32>
    %289 = arith.mulf %288, %263 : vector<8x128xf32>
    %290 = arith.addf %287, %289 : vector<8x128xf32>
    %291 = vector.broadcast %77 : f32 to vector<8x128xf32>
    %292 = arith.addf %290, %291 : vector<8x128xf32>
    %c1_20 = arith.constant 1 : index
    %c0_21 = arith.constant 0 : index
    %c0_22 = arith.constant 0 : index
    %293 = vector.load %arg3[%c1_20, %c0_21, %c0_22] : memref<4x8x128xf32, #tpu.memory_space<vmem>>, vector<1x8x128xf32>
    %294 = vector.shape_cast %293 : vector<1x8x128xf32> to vector<8x128xf32>
    %295 = vector.shape_cast %292 : vector<8x128xf32> to vector<1x8x128xf32>
    tpu.vector_store %arg3[%c1_20, %c0_21, %c0_22], %295 {strides = array<i32>} : memref<4x8x128xf32, #tpu.memory_space<vmem>>, vector<1x8x128xf32>,
    %296 = vector.broadcast %68 : f32 to vector<8x128xf32>
    %297 = arith.mulf %296, %251 : vector<8x128xf32>
    %298 = vector.broadcast %69 : f32 to vector<8x128xf32>
    %299 = arith.mulf %298, %255 : vector<8x128xf32>
    %300 = arith.addf %297, %299 : vector<8x128xf32>
    %301 = vector.broadcast %70 : f32 to vector<8x128xf32>
    %302 = arith.mulf %301, %259 : vector<8x128xf32>
    %303 = arith.addf %300, %302 : vector<8x128xf32>
    %304 = vector.broadcast %71 : f32 to vector<8x128xf32>
    %305 = arith.mulf %304, %263 : vector<8x128xf32>
    %306 = arith.addf %303, %305 : vector<8x128xf32>
    %307 = vector.broadcast %78 : f32 to vector<8x128xf32>
    %308 = arith.addf %306, %307 : vector<8x128xf32>
    %c2_23 = arith.constant 2 : index
    %c0_24 = arith.constant 0 : index
    %c0_25 = arith.constant 0 : index
    %309 = vector.load %arg3[%c2_23, %c0_24, %c0_25] : memref<4x8x128xf32, #tpu.memory_space<vmem>>, vector<1x8x128xf32>
    %310 = vector.shape_cast %309 : vector<1x8x128xf32> to vector<8x128xf32>
    %311 = vector.shape_cast %308 : vector<8x128xf32> to vector<1x8x128xf32>
    tpu.vector_store %arg3[%c2_23, %c0_24, %c0_25], %311 {strides = array<i32>} : memref<4x8x128xf32, #tpu.memory_space<vmem>>, vector<1x8x128xf32>,
    %312 = vector.broadcast %72 : f32 to vector<8x128xf32>
    %313 = arith.mulf %312, %251 : vector<8x128xf32>
    %314 = vector.broadcast %73 : f32 to vector<8x128xf32>
    %315 = arith.mulf %314, %255 : vector<8x128xf32>
    %316 = arith.addf %313, %315 : vector<8x128xf32>
    %317 = vector.broadcast %74 : f32 to vector<8x128xf32>
    %318 = arith.mulf %317, %259 : vector<8x128xf32>
    %319 = arith.addf %316, %318 : vector<8x128xf32>
    %320 = vector.broadcast %75 : f32 to vector<8x128xf32>
    %321 = arith.mulf %320, %263 : vector<8x128xf32>
    %322 = arith.addf %319, %321 : vector<8x128xf32>
    %323 = vector.broadcast %79 : f32 to vector<8x128xf32>
    %324 = arith.addf %322, %323 : vector<8x128xf32>
    %c3_26 = arith.constant 3 : index
    %c0_27 = arith.constant 0 : index
    %c0_28 = arith.constant 0 : index
    %325 = vector.load %arg3[%c3_26, %c0_27, %c0_28] : memref<4x8x128xf32, #tpu.memory_space<vmem>>, vector<1x8x128xf32>
    %326 = vector.shape_cast %325 : vector<1x8x128xf32> to vector<8x128xf32>
    %327 = vector.shape_cast %324 : vector<8x128xf32> to vector<1x8x128xf32>
    tpu.vector_store %arg3[%c3_26, %c0_27, %c0_28], %327 {strides = array<i32>} : memref<4x8x128xf32, #tpu.memory_space<vmem>>, vector<1x8x128xf32>,
    return
  }
  func.func @transform_0(%arg0: i32) -> (i32, i32, i32) {
    %c0_i32 = arith.constant 0 : i32
    %c0_i32_0 = arith.constant 0 : i32
    %c0_i32_1 = arith.constant 0 : i32
    return %c0_i32, %arg0, %c0_i32_0 : i32, i32, i32
  }
  func.func @transform_1(%arg0: i32) -> i32 {
    %c0_i32 = arith.constant 0 : i32
    %c0_i32_0 = arith.constant 0 : i32
    return %c0_i32 : i32
  }
  func.func @transform_2(%arg0: i32) -> (i32, i32, i32) {
    %c0_i32 = arith.constant 0 : i32
    %c0_i32_0 = arith.constant 0 : i32
    %c0_i32_1 = arith.constant 0 : i32
    return %c0_i32, %arg0, %c0_i32_0 : i32, i32, i32
  }
}

</mosaic_0001>

<bundles_post_ra>
// kernel: tpu_custom_call.1
= control target key start
LH: loop header
LB: loop body
LE: loop exit
PB: predicated region body
PF: predicated region fallthrough
CT: control target
= control target key end

     0   :  { %7 = vsyncpa [#allocation3], 0  ;;  %s768_s0 = inlined_call_operand.hbm [shape: f32[2,8,128], index: 0, kind: input, shape index: {}]   ;;  %s769_s1 = inlined_call_operand.vmem [shape: f32[80], index: 1, kind: input, shape index: {}]   ;;  %s770_s2 = inlined_call_operand.hbm [shape: f32[4,8,128], index: 2, kind: output, shape index: {}]  }
   0x1   :  { %8 = vsyncpa [#allocation5], 0 }
   0x2   :  { %9 = vsyncpa [#allocation4], 0  ;;  %s509_s9 = smov [#allocation2]   ;;  %s28_s13 = sshll.u32 %s769_s1, 4  ;;  %s29_s13 = int_to_ptr.vmem [resolvable:$true] %s28_s13 }
   0x3   :  { %s15_s10 = sshll.u32 %s509_s9, 4  ;;  %s16_s10 = int_to_ptr.vmem [resolvable:$true] %s15_s10 }
   0x4   :  { %s459_s14 = scalar_lea.vmem %s16_s10, 256  ;;  %p464_p1 = scmp.lt.s32.totalorder %s16_s10, %s16_s10 }
   0x5   :  { %p460_p0 = scmp.ne.s32.totalorder %s16_s10, %s459_s14  ;;  %p465_p2 = scmp.lt.s32.totalorder %s459_s14, %s459_s14 }
   0x7   :  { %p466_p3 = por %p465_p2, %p464_p1 }
   0x9   :  { %p467_p4 = pnand %p466_p3, %p460_p0 }
   0xb   :  { %470 = shalt.err (!%p467_p4)
}
   0xc   :  { %s510_s15 = smov 128   ;;  %s511_s16 = smov 8  }
   0xd   :  { %21 = dma.hbm_to_vmem [thread:$0]  %s768_s0, 256, %s16_s10, [#allocation3], %s510_s15, %s510_s15, %s511_s16  }
   0xe   :  { %s471_s19 = scalar_lea.vmem %s29_s13, 16  ;;  %p476_p6 = scmp.lt.s32.totalorder %s29_s13, %s29_s13 }
   0xf   :  { %p472_p5 = scmp.ne.s32.totalorder %s29_s13, %s471_s19  ;;  %p477_p7 = scmp.lt.s32.totalorder %s471_s19, %s471_s19 }
  0x11   :  { %p478_p8 = por %p477_p7, %p476_p6 }
  0x13   :  { %p479_p9 = pnand %p478_p8, %p472_p5 }
  0x15   :  { %482 = shalt.err (!%p479_p9)
}
  0x16   :  { %s512_s1 = smov [#allocation6]  }
  0x17   :  { %31 = dma.vmem_to_smem %s29_s13, 16, %s512_s1, [#allocation5]  }
  0x18   :  { %503 = dma.done.wait [#allocation3], 256  }
  0x19   :  { %504 = vsyncadd [#allocation3], 4294967040 }
  0x1a   :  { %505 = dma.done.wait [#allocation5], 16  }
  0x1b   :  { %506 = vsyncadd [#allocation5], 4294967280 }
  0x1c   :  { %38 = sfence }
  0x1d   :  { %s39_s20 = sld [smem:[#allocation6]]  ;;  %v552_v0 = vld [vmem:[#allocation2] sm:$0xff]  ;;  %v554_v1 = vld [vmem:[#allocation2 + $0x8] sm:$0xff] }
  0x1e   :  { %s367_s21 = sld [smem:[#allocation6 + $0x1]] }
  0x1f   :  { %s368_s22 = sld [smem:[#allocation6 + $0x2]] }
  0x20   :  { %s369_s23 = sld [smem:[#allocation6 + $0x3]] }
  0x21   :  { %s370_s0 = sld [smem:[#allocation6 + $0x4]] }
  0x22   :  { %s371_s24 = sld [smem:[#allocation6 + $0x5]] }
  0x23   :  { %s538_s25 = sld [smem:[#allocation6 + $0x6]]  ;;  %v122_v2 = vstv %s39_s20 }
  0x24   :  { %s540_s26 = sld [smem:[#allocation6 + $0x7]]  ;;  %v124_v3 = vstv %s367_s21  ;;  %v123_v8 = vmul.f32 %v122_v2, %v552_v0 }
  0x25   :  { %s542_s27 = sld [smem:[#allocation6 + $0x8]]  ;;  %v138_v4 = vstv %s368_s22  ;;  %v125_v9 = vmul.f32 %v124_v3, %v554_v1 }
  0x26   :  { %s544_s28 = sld [smem:[#allocation6 + $0x9]]  ;;  %v140_v5 = vstv %s369_s23  ;;  %v139_v10 = vmul.f32 %v138_v4, %v552_v0 }
  0x27   :  { %s546_s29 = sld [smem:[#allocation6 + $0xa]]  ;;  %v158_v6 = vstv %s370_s0  ;;  %v141_v11 = vmul.f32 %v140_v5, %v554_v1  ;;  %v126_v16 = vadd.f32 %v125_v9, %v123_v8 }
  0x28   :  { %s548_s30 = sld [smem:[#allocation6 + $0xb]]  ;;  %v160_v7 = vstv %s371_s24  ;;  %v159_v12 = vmul.f32 %v158_v6, %v552_v0 }
  0x29   :  { %s550_s3 = sld [smem:[#allocation6 + $0xc]]  ;;  %v161_v13 = vmul.f32 %v160_v7, %v554_v1  ;;  %v178_v14 = vstv %s538_s25  ;;  %v142_v17 = vadd.f32 %v141_v11, %v139_v10 }
  0x2a   :  { %s556_s4 = sld [smem:[#allocation6 + $0xd]]  ;;  %v180_v15 = vstv %s540_s26  ;;  %v179_v19 = vmul.f32 %v178_v14, %v552_v0 }
  0x2b   :  { %s558_s5 = sld [smem:[#allocation6 + $0xe]]  ;;  %v162_v18 = vadd.f32 %v161_v13, %v159_v12  ;;  %v181_v20 = vmul.f32 %v180_v15, %v554_v1  ;;  %v198_v22 = vstv %s542_s27 }
  0x2c   :  { %s560_s6 = sld [smem:[#allocation6 + $0xf]]  ;;  %v200_v23 = vstv %s544_s28  ;;  %v199_v32 = vmul.f32 %v198_v22, %v552_v0 }
  0x2d   :  { %s382_s7 = sld [smem:[#allocation6 + $0x10]]  ;;  %v218_v28 = vstv %s546_s29  ;;  %v182_v31 = vadd.f32 %v181_v20, %v179_v19  ;;  %v201_v33 = vmul.f32 %v200_v23, %v554_v1 }
  0x2e   :  { %s383_s8 = sld [smem:[#allocation6 + $0x11]]  ;;  %v220_v29 = vstv %s548_s30  ;;  %v219_v36 = vmul.f32 %v218_v28, %v552_v0 }
  0x2f   :  { %s384_s9 = sld [smem:[#allocation6 + $0x12]]  ;;  %v221_v37 = vmul.f32 %v220_v29, %v554_v1  ;;  %v238_v38 = vstv %s550_s3  ;;  %v202_v43 = vadd.f32 %v201_v33, %v199_v32 }
  0x30   :  { %s570_s10 = sld [smem:[#allocation6 + $0x13]]  ;;  %v240_v40 = vstv %s556_s4  ;;  %v239_v46 = vmul.f32 %v238_v38, %v552_v0 }
  0x31   :  { %s572_s11 = sld [smem:[#allocation6 + $0x14]]  ;;  %v222_v49 = vadd.f32 %v221_v37, %v219_v36  ;;  %v241_v50 = vmul.f32 %v240_v40, %v554_v1  ;;  %v258_v53 = vstv %s558_s5 }
  0x32   :  { %s574_s12 = sld [smem:[#allocation6 + $0x15]]  ;;  %v260_v54 = vstv %s560_s6  ;;  %v259_v62 = vmul.f32 %v258_v53, %v552_v0 }
  0x33   :  { %s578_s13 = sld [smem:[#allocation6 + $0x16]]  ;;  %v127_v21 = vstv %s382_s7  ;;  %v242_v61 = vadd.f32 %v241_v50, %v239_v46  ;;  %v261_v63 = vmul.f32 %v260_v54, %v554_v1 }
  0x34   :  { %s582_s14 = sld [smem:[#allocation6 + $0x17]]  ;;  %v128_v24 = vadd.f32 %v127_v21, %v126_v16  ;;  %v143_v25 = vstv %s383_s8 }
  0x35   :  { %s390_s17 = sld [smem:[#allocation6 + $0x18]]  ;;  %v144_v26 = vadd.f32 %v143_v25, %v142_v17  ;;  %v163_v27 = vstv %s384_s9  ;;  %v262_v10 = vadd.f32 %v261_v63, %v259_v62 }
  0x36   :  { %s391_s18 = sld [smem:[#allocation6 + $0x19]]  ;;  %v164_v30 = vadd.f32 %v163_v27, %v162_v18  ;;  %v183_v34 = vstv %s570_s10  ;;  %v591_v35 = vmax.f32 %v128_v24, 0.0 }
  0x37   :  { %s392_s19 = sld [smem:[#allocation6 + $0x1a]]  ;;  %v598_v39 = vmax.f32 %v144_v26, 0.0  ;;  %v184_v42 = vadd.f32 %v183_v34, %v182_v31  ;;  %v203_v45 = vstv %s572_s11 }
  0x38   :  { %s589_s1 = sld [smem:[#allocation6 + $0x1b]]  ;;  %v603_v41 = vmax.f32 %v164_v30, 0.0  ;;  %v204_v57 = vadd.f32 %v203_v45, %v202_v43  ;;  %v223_v58 = vstv %s574_s12 }
  0x39   :  { %s596_s20 = sld [smem:[#allocation6 + $0x1c]]  ;;  %v617_v56 = vmax.f32 %v184_v42, 0.0  ;;  %v224_v2 = vadd.f32 %v223_v58, %v222_v49  ;;  %v243_v3 = vstv %s578_s13 }
  0x3a   :  { %s601_s21 = sld [smem:[#allocation6 + $0x1d]]  ;;  %v631_v6 = vmax.f32 %v204_v57, 0.0  ;;  %v244_v9 = vadd.f32 %v243_v3, %v242_v61  ;;  %v263_v14 = vstv %s582_s14 }
  0x3b   :  { %s605_s22 = sld [smem:[#allocation6 + $0x1e]]  ;;  %v130_v44 = vstv %s390_s17  ;;  %v640_v13 = vmax.f32 %v224_v2, 0.0  ;;  %v264_v23 = vadd.f32 %v263_v14, %v262_v10 }
  0x3c   :  { %s609_s23 = sld [smem:[#allocation6 + $0x1f]]  ;;  %v131_v47 = vmul.f32 %v130_v44, %v591_v35  ;;  %v146_v48 = vstv %s391_s18  ;;  %v658_v29 = vmax.f32 %v244_v9, 0.0 }
  0x3d   :  { %s398_s0 = sld [smem:[#allocation6 + $0x20]]  ;;  %v147_v51 = vmul.f32 %v146_v48, %v598_v39  ;;  %v166_v52 = vstv %s392_s19  ;;  %v667_v37 = vmax.f32 %v264_v23, 0.0 }
  0x3e   :  { %s399_s24 = sld [smem:[#allocation6 + $0x21]]  ;;  %v167_v55 = vmul.f32 %v166_v52, %v603_v41  ;;  %v186_v60 = vstv %s589_s1 }
  0x3f   :  { %s400_s25 = sld [smem:[#allocation6 + $0x22]]  ;;  %v148_v59 = vadd.f32 %v147_v51, %v131_v47  ;;  %v187_v5 = vmul.f32 %v186_v60, %v617_v56  ;;  %v206_v8 = vstv %s596_s20 }
  0x40   :  { %s621_s26 = sld [smem:[#allocation6 + $0x23]]  ;;  %v207_v18 = vmul.f32 %v206_v8, %v631_v6  ;;  %v226_v22 = vstv %s601_s21 }
  0x41   :  { %s625_s27 = sld [smem:[#allocation6 + $0x24]]  ;;  %v168_v4 = vadd.f32 %v167_v55, %v148_v59  ;;  %v227_v28 = vmul.f32 %v226_v22, %v640_v13  ;;  %v246_v32 = vstv %s605_s22 }
  0x42   :  { %s628_s28 = sld [smem:[#allocation6 + $0x25]]  ;;  %v247_v47 = vmul.f32 %v246_v32, %v658_v29  ;;  %v266_v51 = vstv %s609_s23 }
  0x43   :  { %s633_s29 = sld [smem:[#allocation6 + $0x26]]  ;;  %v132_v7 = vstv %s398_s0  ;;  %v188_v16 = vadd.f32 %v187_v5, %v168_v4  ;;  %v267_v61 = vmul.f32 %v266_v51, %v667_v37 }
  0x44   :  { %s636_s30 = sld [smem:[#allocation6 + $0x27]]  ;;  %v133_v0 = vmul.f32 %v132_v7, %v591_v35  ;;  %v149_v1 = vstv %s399_s24 }
  0x45   :  { %s406_s3 = sld [smem:[#allocation6 + $0x28]]  ;;  %v150_v11 = vmul.f32 %v149_v1, %v598_v39  ;;  %v169_v12 = vstv %s400_s25  ;;  %v208_v27 = vadd.f32 %v207_v18, %v188_v16 }
  0x46   :  { %s407_s4 = sld [smem:[#allocation6 + $0x29]]  ;;  %v170_v15 = vmul.f32 %v169_v12, %v603_v41  ;;  %v189_v17 = vstv %s621_s26 }
  0x47   :  { %s408_s5 = sld [smem:[#allocation6 + $0x2a]]  ;;  %v151_v19 = vadd.f32 %v150_v11, %v133_v0  ;;  %v190_v20 = vmul.f32 %v189_v17, %v617_v56  ;;  %v209_v21 = vstv %s625_s27  ;;  %v228_v46 = vadd.f32 %v227_v28, %v208_v27 }
  0x48   :  { %s649_s6 = sld [smem:[#allocation6 + $0x2b]]  ;;  %v210_v25 = vmul.f32 %v209_v21, %v631_v6  ;;  %v229_v26 = vstv %s628_s28 }
  0x49   :  { %s651_s7 = sld [smem:[#allocation6 + $0x2c]]  ;;  %v171_v24 = vadd.f32 %v170_v15, %v151_v19  ;;  %v230_v36 = vmul.f32 %v229_v26, %v640_v13  ;;  %v249_v43 = vstv %s633_s29  ;;  %v248_v59 = vadd.f32 %v247_v47, %v228_v46 }
  0x4a   :  { %s655_s8 = sld [smem:[#allocation6 + $0x2d]]  ;;  %v250_v54 = vmul.f32 %v249_v43, %v658_v29  ;;  %v269_v58 = vstv %s636_s30 }
  0x4b   :  { %s660_s9 = sld [smem:[#allocation6 + $0x2e]]  ;;  %v134_v30 = vstv %s406_s3  ;;  %v191_v31 = vadd.f32 %v190_v20, %v171_v24  ;;  %v270_v8 = vmul.f32 %v269_v58, %v667_v37  ;;  %v268_v18 = vadd.f32 %v267_v61, %v248_v59 }
  0x4c   :  { %s663_s10 = sld [smem:[#allocation6 + $0x2f]]  ;;  %v135_v33 = vmul.f32 %v134_v30, %v591_v35  ;;  %v152_v34 = vstv %s407_s4 }
  0x4d   :  { %s669_s11 = sld [smem:[#allocation6 + $0x30]]  ;;  %v153_v38 = vmul.f32 %v152_v34, %v598_v39  ;;  %v172_v40 = vstv %s408_s5  ;;  %v211_v42 = vadd.f32 %v210_v25, %v191_v31 }
  0x4e   :  { %s673_s12 = sld [smem:[#allocation6 + $0x31]]  ;;  %v173_v44 = vmul.f32 %v172_v40, %v603_v41  ;;  %v192_v45 = vstv %s649_s6 }
  0x4f   :  { %s678_s13 = sld [smem:[#allocation6 + $0x32]]  ;;  %v154_v48 = vadd.f32 %v153_v38, %v135_v33  ;;  %v193_v49 = vmul.f32 %v192_v45, %v617_v56  ;;  %v212_v50 = vstv %s651_s7  ;;  %v231_v52 = vadd.f32 %v230_v36, %v211_v42 }
  0x50   :  { %s683_s14 = sld [smem:[#allocation6 + $0x33]]  ;;  %v232_v53 = vstv %s655_s8  ;;  %v213_v57 = vmul.f32 %v212_v50, %v631_v6 }
  0x51   :  { %s687_s17 = sld [smem:[#allocation6 + $0x34]]  ;;  %v174_v55 = vadd.f32 %v173_v44, %v154_v48  ;;  %v252_v60 = vstv %s660_s9  ;;  %v233_v2 = vmul.f32 %v232_v53, %v640_v13  ;;  %v251_v7 = vadd.f32 %v250_v54, %v231_v52 }
  0x52   :  { %s691_s18 = sld [smem:[#allocation6 + $0x35]]  ;;  %v272_v3 = vstv %s663_s10  ;;  %v253_v10 = vmul.f32 %v252_v60, %v658_v29 }
  0x53   :  { %s695_s19 = sld [smem:[#allocation6 + $0x36]]  ;;  %v136_v62 = vstv %s669_s11  ;;  %v194_v63 = vadd.f32 %v193_v49, %v174_v55  ;;  %v271_v21 = vadd.f32 %v270_v8, %v251_v7 }
  0x54   :  { %s700_s1 = sld [smem:[#allocation6 + $0x37]]  ;;  %v137_v4 = vmul.f32 %v136_v62, %v591_v35  ;;  %v155_v5 = vstv %s673_s12  ;;  %v273_v35 = vmul.f32 %v272_v3, %v667_v37 }
  0x55   :  { %s705_s20 = sld [smem:[#allocation6 + $0x38]]  ;;  %v156_v0 = vmul.f32 %v155_v5, %v598_v39  ;;  %v175_v1 = vstv %s678_s13  ;;  %v214_v9 = vadd.f32 %v213_v57, %v194_v63 }
  0x56   :  { %s710_s21 = sld [smem:[#allocation6 + $0x39]]  ;;  %v176_v11 = vmul.f32 %v175_v1, %v603_v41  ;;  %v195_v12 = vstv %s683_s14 }
  0x57   :  { %s424_s22 = sld [smem:[#allocation6 + $0x3a]]  ;;  %v157_v14 = vadd.f32 %v156_v0, %v137_v4  ;;  %v196_v15 = vmul.f32 %v195_v12, %v617_v56  ;;  %v215_v16 = vstv %s687_s17  ;;  %v234_v17 = vadd.f32 %v233_v2, %v214_v9  ;;  %s513_s17 = smov [#allocation7]  }
  0x58   :  { %s717_s23 = sld [smem:[#allocation6 + $0x3b]]  ;;  %v235_v39 = vstv %s691_s18  ;;  %v216_v41 = vmul.f32 %v215_v16, %v631_v6  ;;  %s354_s18 = sshll.u32 %s513_s17, 4  ;;  %s355_s18 = int_to_ptr.vmem [resolvable:$true] %s354_s18 }
  0x59   :  { %s426_s0 = sld [smem:[#allocation6 + $0x3c]]  ;;  %v177_v19 = vadd.f32 %v176_v11, %v157_v14  ;;  %v254_v20 = vadd.f32 %v253_v10, %v234_v17  ;;  %v255_v22 = vstv %s695_s19  ;;  %v236_v23 = vmul.f32 %v235_v39, %v640_v13  ;;  %s483_s19 = scalar_lea.vmem %s355_s18, 512 }
  0x5a   :  { %s427_s24 = sld [smem:[#allocation6 + $0x3d]]  ;;  %v275_v26 = vstv %s700_s1  ;;  %v256_v6 = vmul.f32 %v255_v22, %v658_v29  ;;  %p484_p10 = scmp.ne.s32.totalorder %s355_s18, %s483_s19 }
  0x5b   :  { %s722_s25 = sld [smem:[#allocation6 + $0x3e]]  ;;  %v197_v56 = vadd.f32 %v196_v15, %v177_v19  ;;  %v274_v24 = vadd.f32 %v273_v35, %v254_v20  ;;  %v278_v25 = vstv %s705_s20  ;;  %v276_v36 = vmul.f32 %v275_v26, %v667_v37  ;;  %p488_p11 = scmp.lt.s32.totalorder %s355_s18, %s355_s18 }
  0x5c   :  { %s726_s26 = sld [smem:[#allocation6 + $0x3f]]  ;;  %v279_v27 = vadd.f32 %v278_v25, %v268_v18  ;;  %v281_v28 = vstv %s710_s21  ;;  %p489_p12 = scmp.lt.s32.totalorder %s483_s19, %s483_s19 }
  0x5d   :  { %s730_s27 = sld [smem:[#allocation6 + $0x4c]]  ;;  %v217_v30 = vadd.f32 %v216_v41, %v197_v56  ;;  %v282_v31 = vadd.f32 %v281_v28, %v271_v21  ;;  %v284_v32 = vstv %s424_s22 }
  0x5e   :  { %v733_v33 = vmax.f32 %v279_v27, 0.0  ;;  %v285_v34 = vadd.f32 %v284_v32, %v274_v24  ;;  %s430_s28 = sld [smem:[#allocation6 + $0x40]]  ;;  %v287_v47 = vstv %s717_s23  ;;  %p490_p13 = por %p489_p12, %p488_p11 }
  0x5f   :  { %v237_v13 = vadd.f32 %v236_v23, %v217_v30  ;;  %v736_v38 = vmax.f32 %v282_v31, 0.0  ;;  %v290_v40 = vstv %s426_s0  ;;  %s431_s29 = sld [smem:[#allocation6 + $0x41]] }
  0x60   :  { %v738_v42 = vmax.f32 %v285_v34, 0.0  ;;  %v291_v43 = vmul.f32 %v290_v40, %v733_v33  ;;  %v292_v29 = vstv %s427_s24  ;;  %s432_s30 = sld [smem:[#allocation6 + $0x42]]  ;;  %p491_p0 = pnand %p490_p13, %p484_p10 }
  0x61   :  { %v257_v44 = vadd.f32 %v256_v6, %v237_v13  ;;  %v293_v45 = vmul.f32 %v292_v29, %v736_v38  ;;  %v295_v46 = vstv %s722_s25  ;;  %s433_s3 = sld [smem:[#allocation6 + $0x43]] }
  0x62   :  { %s744_s4 = sld [smem:[#allocation6 + $0x4d]]  ;;  %v296_v49 = vmul.f32 %v295_v46, %v738_v42  ;;  %v298_v54 = vstv %s726_s26 }
  0x63   :  { %v277_v37 = vadd.f32 %v276_v36, %v257_v44  ;;  %v294_v48 = vadd.f32 %v293_v45, %v291_v43  ;;  %s434_s5 = sld [smem:[#allocation6 + $0x44]]  ;;  %v301_v4 = vstv %s730_s27 }
  0x64   :  { %v304_v50 = vstv %s430_s28  ;;  %s435_s6 = sld [smem:[#allocation6 + $0x45]] }
  0x65   :  { %v288_v51 = vadd.f32 %v287_v47, %v277_v37  ;;  %v305_v52 = vmul.f32 %v304_v50, %v733_v33  ;;  %v306_v53 = vstv %s431_s29  ;;  %s436_s7 = sld [smem:[#allocation6 + $0x46]]  ;;  %v297_v59 = vadd.f32 %v296_v49, %v294_v48 }
  0x66   :  { %v307_v55 = vmul.f32 %v306_v53, %v736_v38  ;;  %v309_v57 = vstv %s432_s30  ;;  %s437_s8 = sld [smem:[#allocation6 + $0x47]] }
  0x67   :  { %v289_v58 = vmax.f32 %v288_v51, 0.0  ;;  %v310_v60 = vmul.f32 %v309_v57, %v738_v42  ;;  %v312_v61 = vstv %s433_s3  ;;  %s751_s9 = sld [smem:[#allocation6 + $0x4e]] }
  0x68   :  { %v308_v62 = vadd.f32 %v307_v55, %v305_v52  ;;  %s438_s10 = sld [smem:[#allocation6 + $0x48]]  ;;  %v315_v1 = vstv %s744_s4 }
  0x69   :  { %v299_v63 = vmul.f32 %v298_v54, %v289_v58  ;;  %v313_v2 = vmul.f32 %v312_v61, %v289_v58  ;;  %v319_v3 = vstv %s434_s5  ;;  %s439_s11 = sld [smem:[#allocation6 + $0x49]] }
  0x6a   :  { %v311_v5 = vadd.f32 %v310_v60, %v308_v62  ;;  %v320_v7 = vmul.f32 %v319_v3, %v733_v33  ;;  %v321_v8 = vstv %s435_s6  ;;  %s440_s12 = sld [smem:[#allocation6 + $0x4a]] }
  0x6b   :  { %v300_v0 = vadd.f32 %v299_v63, %v297_v59  ;;  %v322_v9 = vmul.f32 %v321_v8, %v736_v38  ;;  %v324_v10 = vstv %s436_s7  ;;  %s441_s13 = sld [smem:[#allocation6 + $0x4b]] }
  0x6c   :  { %v314_v11 = vadd.f32 %v313_v2, %v311_v5  ;;  %v325_v12 = vmul.f32 %v324_v10, %v738_v42  ;;  %v327_v35 = vstv %s437_s8  ;;  %s445_s14 = sld [smem:[#allocation6 + $0x4f]] }
  0x6d   :  { %v302_v14 = vadd.f32 %v301_v4, %v300_v0  ;;  %v323_v15 = vadd.f32 %v322_v9, %v320_v7  ;;  %v328_v16 = vmul.f32 %v327_v35, %v289_v58  ;;  %v330_v20 = vstv %s751_s9 }
  0x6e   :  { %v316_v17 = vadd.f32 %v315_v1, %v314_v11  ;;  %v334_v39 = vstv %s438_s10 }
  0x6f   :  { %303 = vst [vmem:[#allocation7] sm:$0xff] %v302_v14  ;;  %v326_v18 = vadd.f32 %v325_v12, %v323_v15  ;;  %v335_v19 = vmul.f32 %v334_v39, %v733_v33  ;;  %v336_v41 = vstv %s439_s11 }
  0x70   :  { %318 = vst [vmem:[#allocation7 + $0x8] sm:$0xff] %v316_v17  ;;  %v337_v21 = vmul.f32 %v336_v41, %v736_v38  ;;  %v339_v22 = vstv %s440_s12 }
  0x71   :  { %v329_v56 = vadd.f32 %v328_v16, %v326_v18  ;;  %v340_v23 = vmul.f32 %v339_v22, %v738_v42  ;;  %v342_v24 = vstv %s441_s13 }
  0x72   :  { %v338_v25 = vadd.f32 %v337_v21, %v335_v19  ;;  %v343_v26 = vmul.f32 %v342_v24, %v289_v58  ;;  %v345_v30 = vstv %s445_s14 }
  0x73   :  { %v331_v27 = vadd.f32 %v330_v20, %v329_v56 }
  0x74   :  { %v341_v28 = vadd.f32 %v340_v23, %v338_v25 }
  0x75   :  { %333 = vst [vmem:[#allocation7 + $0x10] sm:$0xff] %v331_v27 }
  0x76   :  { %v344_v6 = vadd.f32 %v343_v26, %v341_v28 }
  0x78   :  { %v346_v31 = vadd.f32 %v345_v30, %v344_v6 }
  0x7a   :  { %348 = vst [vmem:[#allocation7 + $0x18] sm:$0xff] %v346_v31 }
  0x7b   :  { %494 = shalt.err (!%p491_p0)
}
  0x7c   :  { %360 = dma.vmem_to_hbm [thread:$0]  %s355_s18, 512, %s770_s2, [#allocation4], %s510_s15, %s510_s15, %s511_s16  }
  0x7d   :  { %507 = dma.done.wait [#allocation4], 512  }
  0x7e   :  { %508 = vsyncadd [#allocation4], 4294966784 }
  0x7f   :  { %364 = vsyncpa [#allocation3], 1 }
  0x80   :  { %365 = vsyncpa [#allocation4], 1 }
  0x81   :  { %366 = vsyncpa [#allocation5], 1 }

</bundles_post_ra>
